<compile_context>
chip_gen: v6e
topology: v6e:2x2x1
jax: 0.10.0
libtpu: 0.0.40
codegen_flags: <defaults>
</compile_context>

<pallas_src>
import functools

import jax
import jax.numpy as jnp
from jax import lax
from jax.experimental import pallas as pl
from jax.experimental.pallas import tpu as pltpu


# ---------------------------------------------------------------------------
# Kernel 1: KG aggregation (gather tail rows, multiply by relation rows,
# scatter-mean onto head entities).  Edge-tiled grid, sequential accumulation.
# ---------------------------------------------------------------------------
def kg_agg_kernel(head_ref, tail_ref, rel_ref,      # scalar-prefetch (SMEM, int32[E])
                  entity_ref, weight_ref,           # VMEM, resident across grid
                  out_ref,                          # VMEM resident accumulator [N, C]
                  cnt_ref,                          # VMEM scratch [N, 1]
                  *, edges_per_tile, n_edges):
    tile = pl.program_id(0)

    @pl.when(tile == 0)
    def _init():
        out_ref[...] = jnp.zeros_like(out_ref)
        cnt_ref[...] = jnp.zeros_like(cnt_ref)

    base = tile * edges_per_tile
    n_valid = jnp.minimum(edges_per_tile, n_edges - base)

    def body(j, carry):
        e = base + j
        h = head_ref[e]                              # SMEM scalar reads
        t = tail_ref[e]
        r = rel_ref[e]
        # real gather of one entity row and one relation row (no one-hots)
        neigh = entity_ref[pl.ds(t, 1), :] * weight_ref[pl.ds(r, 1), :]   # [1, C]
        # index-based scatter-add (grid axis is sequential => no write races)
        out_ref[pl.ds(h, 1), :] = out_ref[pl.ds(h, 1), :] + neigh
        cnt_ref[pl.ds(h, 1), :] = cnt_ref[pl.ds(h, 1), :] + 1.0
        return carry

    lax.fori_loop(0, n_valid, body, 0)

    @pl.when(tile == pl.num_programs(0) - 1)
    def _finalize():
        # scatter_mean semantics: rows with zero in-degree stay 0.
        out_ref[...] = out_ref[...] / jnp.maximum(cnt_ref[...], 1.0)


# ---------------------------------------------------------------------------
# Kernel 2: fused user + item aggregation over the (dense-ified) interaction
# matrices.  The softmax attention sum is identically 1, so the output is
# exactly 2 * (interact_mat @ aspect_emb); the dead score path is removed.
# ---------------------------------------------------------------------------
def interact_agg_kernel(aspect_ref, mat_ref, out_ref):
    out_ref[...] = 2.0 * jnp.dot(mat_ref[...], aspect_ref[...],
                                 preferred_element_type=jnp.float32)


# ---------------------------------------------------------------------------
# Python wrapper (glue): pallas_call plumbing, padding, output splitting.
# ---------------------------------------------------------------------------
def aggregator_forward(entity_emb, item_emb, user_emb, aspect_emb,
                       edge_index, edge_type, ua_mat, ia_mat, weight,
                       *, edges_per_tile=64, rows_per_tile=8):
    del item_emb, user_emb  # only needed for the mathematically-dead softmax path
    n_entities, channel = entity_emb.shape
    n_rel = weight.shape[0]
    n_users = ua_mat.shape[0]
    n_items = ia_mat.shape[0]
    n_aspects = aspect_emb.shape[0]
    n_edges = edge_index.shape[1]

    head = edge_index[0].astype(jnp.int32)
    tail = edge_index[1].astype(jnp.int32)
    rel = edge_type.astype(jnp.int32) - 2          # precondition: in [0, n_rel)

    n_edge_tiles = int(pl.cdiv(n_edges, edges_per_tile))

    kg_kernel = functools.partial(
        kg_agg_kernel, edges_per_tile=edges_per_tile, n_edges=n_edges)

    entity_agg = pl.pallas_call(
        kg_kernel,
        out_shape=jax.ShapeDtypeStruct((n_entities, channel), jnp.float32),
        grid_spec=pltpu.PrefetchScalarGridSpec(
            num_scalar_prefetch=3,                 # head, tail, rel -> SMEM
            grid=(n_edge_tiles,),
            in_specs=[
                # full tables, constant block index => DMA'd once, resident
                pl.BlockSpec((n_entities, channel), lambda i, h, t, r: (0, 0)),
                pl.BlockSpec((n_rel, channel), lambda i, h, t, r: (0, 0)),
            ],
            out_specs=pl.BlockSpec((n_entities, channel),
                                   lambda i, h, t, r: (0, 0)),
            scratch_shapes=[pltpu.VMEM((n_entities, 1), jnp.float32)],
        ),
        compiler_params=pltpu.CompilerParams(
            dimension_semantics=("arbitrary",)),   # sequential scatter accumulation
    )(head, tail, rel, entity_emb, weight)

    # ---- user + item aggregation fused into one call (one launch, one
    # aspect_emb load); row-tiled with a parallel grid axis. ----
    combined_mat = jnp.concatenate([ua_mat, ia_mat], axis=0).astype(jnp.float32)
    n_rows = combined_mat.shape[0]
    n_rows_pad = int(pl.cdiv(n_rows, rows_per_tile)) * rows_per_tile
    if n_rows_pad != n_rows:
        combined_mat = jnp.pad(combined_mat, ((0, n_rows_pad - n_rows), (0, 0)))

    combined_agg = pl.pallas_call(
        interact_agg_kernel,
        out_shape=jax.ShapeDtypeStruct((n_rows_pad, channel), jnp.float32),
        grid=(n_rows_pad // rows_per_tile,),
        in_specs=[
            pl.BlockSpec((n_aspects, channel), lambda i: (0, 0)),
            pl.BlockSpec((rows_per_tile, n_aspects), lambda i: (i, 0)),
        ],
        out_specs=pl.BlockSpec((rows_per_tile, channel), lambda i: (i, 0)),
        compiler_params=pltpu.CompilerParams(
            dimension_semantics=("parallel",)),
    )(aspect_emb, combined_mat)

    user_agg = combined_agg[:n_users]
    item_agg = combined_agg[n_users:n_users + n_items]
    return item_agg, entity_agg, user_agg


# ---------------------------------------------------------------------------
# Pure-JAX reference (for correctness check only) — keeps the full softmax
# path of the PyTorch forward to validate the 2*agg simplification.
# ---------------------------------------------------------------------------
def aggregator_reference(entity_emb, item_emb, user_emb, aspect_emb,
                         edge_index, edge_type, ua_mat, ia_mat, weight):
    n_entities = entity_emb.shape[0]
    head, tail = edge_index[0], edge_index[1]
    edge_relation_emb = weight[edge_type - 2]
    neigh = entity_emb[tail] * edge_relation_emb
    sums = jax.ops.segment_sum(neigh, head, num_segments=n_entities)
    counts = jax.ops.segment_sum(jnp.ones((head.shape[0],), jnp.float32),
                                 head, num_segments=n_entities)
    entity_agg = sums / jnp.maximum(counts, 1.0)[:, None]

    def interact(emb, mat):
        score = jax.nn.softmax(emb @ aspect_emb.T, axis=1)
        s = jnp.sum(score, axis=1, keepdims=True)
        agg = mat @ aspect_emb
        return agg * s + agg

    return interact(item_emb, ia_mat), entity_agg, interact(user_emb, ua_mat)


if __name__ == "__main__":
    key = jax.random.PRNGKey(0)
    n_entities, n_items, n_users, n_aspects = 64, 24, 16, 8
    channel, n_edges, n_rel = 32, 128, 4

    ks = jax.random.split(key, 9)
    entity_emb = jax.random.normal(ks[0], (n_entities, channel), jnp.float32)
    item_emb = jax.random.normal(ks[1], (n_items, channel), jnp.float32)
    user_emb = jax.random.normal(ks[2], (n_users, channel), jnp.float32)
    aspect_emb = jax.random.normal(ks[3], (n_aspects, channel), jnp.float32)
    weight = jax.random.normal(ks[4], (n_rel, channel), jnp.float32)

    head = jax.random.randint(ks[5], (n_edges,), 0, n_entities, jnp.int32)
    tail = jax.random.randint(ks[6], (n_edges,), 0, n_entities, jnp.int32)
    edge_index = jnp.stack([head, tail], axis=0)
    edge_type = jax.random.randint(ks[7], (n_edges,), 2, 2 + n_rel, jnp.int32)

    k_ua, k_ia = jax.random.split(ks[8])
    ua_mat = jax.random.bernoulli(k_ua, 0.3, (n_users, n_aspects)).astype(jnp.float32)
    ia_mat = jax.random.bernoulli(k_ia, 0.3, (n_items, n_aspects)).astype(jnp.float32)

    item_agg, entity_agg, user_agg = aggregator_forward(
        entity_emb, item_emb, user_emb, aspect_emb,
        edge_index, edge_type, ua_mat, ia_mat, weight)
    jax.block_until_ready((item_agg, entity_agg, user_agg))

    item_ref, entity_ref, user_ref = aggregator_reference(
        entity_emb, item_emb, user_emb, aspect_emb,
        edge_index, edge_type, ua_mat, ia_mat, weight)

    assert jnp.allclose(item_agg, item_ref, atol=1e-4, rtol=1e-4)
    assert jnp.allclose(entity_agg, entity_ref, atol=1e-4, rtol=1e-4)
    assert jnp.allclose(user_agg, user_ref, atol=1e-4, rtol=1e-4)

    print("KERNEL_OK")
</pallas_src>

<mosaic_0001>
module attributes {stable_mosaic.version = 11 : i64} {
  func.func @kg_agg_kernel(%arg0: i32, %arg1: memref<128xi32, #tpu.memory_space<smem>>, %arg2: memref<128xi32, #tpu.memory_space<smem>>, %arg3: memref<128xi32, #tpu.memory_space<smem>>, %arg4: memref<64x32xf32, #tpu.memory_space<vmem>>, %arg5: memref<4x32xf32, #tpu.memory_space<vmem>>, %arg6: memref<64x32xf32, #tpu.memory_space<vmem>>, %arg7: memref<64x1xf32, #tpu.memory_space<vmem>>) attributes {dimension_semantics = [#tpu.dimension_semantics<arbitrary>], iteration_bounds = array<i64: 2>, scalar_prefetch = 3 : i64, scratch_operands = 1 : i64, tpu.core_type = #tpu.core_type<tc>, window_params = [{pipeline_mode = #tpu.pipeline_mode<synchronous>, transform_indices = @transform_0, window_bounds = array<i64: 64, 32>}, {pipeline_mode = #tpu.pipeline_mode<synchronous>, transform_indices = @transform_1, window_bounds = array<i64: 4, 32>}, {pipeline_mode = #tpu.pipeline_mode<synchronous>, transform_indices = @transform_2, window_bounds = array<i64: 64, 32>}]} {
    %c0_i32 = arith.constant 0 : i32
    %0 = arith.cmpi eq, %arg0, %c0_i32 : i32
    %1 = arith.extui %0 : i1 to i32
    %c0_i32_0 = arith.constant 0 : i32
    %2 = arith.cmpi ne, %1, %c0_i32_0 : i32
    scf.if %2 {
      %cst = arith.constant 0.000000e+00 : f32
      %11 = vector.broadcast %cst : f32 to vector<64x32xf32>
      %c0 = arith.constant 0 : index
      %c0_6 = arith.constant 0 : index
      %12 = vector.load %arg6[%c0, %c0_6] : memref<64x32xf32, #tpu.memory_space<vmem>>, vector<64x32xf32>
      tpu.vector_store %arg6[%c0, %c0_6], %11 {strides = array<i32>} : memref<64x32xf32, #tpu.memory_space<vmem>>, vector<64x32xf32>,
      %cst_7 = arith.constant 0.000000e+00 : f32
      %13 = vector.broadcast %cst_7 : f32 to vector<64x1xf32>
      %c0_8 = arith.constant 0 : index
      %c0_9 = arith.constant 0 : index
      %14 = vector.load %arg7[%c0_8, %c0_9] : memref<64x1xf32, #tpu.memory_space<vmem>>, vector<64x1xf32>
      tpu.vector_store %arg7[%c0_8, %c0_9], %13 {strides = array<i32>} : memref<64x1xf32, #tpu.memory_space<vmem>>, vector<64x1xf32>,
    } else {
    }
    %c64_i32 = arith.constant 64 : i32
    %3 = arith.muli %arg0, %c64_i32 : i32
    %c128_i32 = arith.constant 128 : i32
    %4 = arith.subi %c128_i32, %3 : i32
    %c64_i32_1 = arith.constant 64 : i32
    %5 = arith.minsi %c64_i32_1, %4 : i32
    %c0_i32_2 = arith.constant 0 : i32
    %c0_i32_3 = arith.constant 0 : i32
    %6 = arith.subi %5, %c0_i32_3 : i32
    %7 = arith.addi %c0_i32_3, %6 : i32
    %c1_i32 = arith.constant 1 : i32
    scf.for %arg8 = %c0_i32_3 to %7 step %c1_i32  : i32 {
      %11 = arith.addi %3, %arg8 : i32
      %12 = arith.index_cast %11 : i32 to index
      %13 = memref.load %arg1[%12] : memref<128xi32, #tpu.memory_space<smem>>
      %14 = arith.index_cast %11 : i32 to index
      %15 = memref.load %arg2[%14] : memref<128xi32, #tpu.memory_space<smem>>
      %16 = arith.index_cast %11 : i32 to index
      %17 = memref.load %arg3[%16] : memref<128xi32, #tpu.memory_space<smem>>
      %18 = arith.index_cast %15 : i32 to index
      %c0 = arith.constant 0 : index
      %19 = vector.load %arg4[%18, %c0] : memref<64x32xf32, #tpu.memory_space<vmem>>, vector<1x32xf32>
      %20 = arith.index_cast %17 : i32 to index
      %c0_6 = arith.constant 0 : index
      %21 = vector.load %arg5[%20, %c0_6] : memref<4x32xf32, #tpu.memory_space<vmem>>, vector<1x32xf32>
      %22 = arith.mulf %19, %21 : vector<1x32xf32>
      %23 = arith.index_cast %13 : i32 to index
      %c0_7 = arith.constant 0 : index
      %24 = vector.load %arg6[%23, %c0_7] : memref<64x32xf32, #tpu.memory_space<vmem>>, vector<1x32xf32>
      %25 = arith.addf %24, %22 : vector<1x32xf32>
      %26 = arith.index_cast %13 : i32 to index
      %c0_8 = arith.constant 0 : index
      %27 = vector.load %arg6[%26, %c0_8] : memref<64x32xf32, #tpu.memory_space<vmem>>, vector<1x32xf32>
      tpu.vector_store %arg6[%26, %c0_8], %25 {strides = array<i32>} : memref<64x32xf32, #tpu.memory_space<vmem>>, vector<1x32xf32>,
      %28 = arith.index_cast %13 : i32 to index
      %c0_9 = arith.constant 0 : index
      %29 = vector.load %arg7[%28, %c0_9] : memref<64x1xf32, #tpu.memory_space<vmem>>, vector<1x1xf32>
      %cst = arith.constant 1.000000e+00 : f32
      %30 = vector.broadcast %cst : f32 to vector<1x1xf32>
      %31 = arith.addf %29, %30 : vector<1x1xf32>
      %32 = arith.index_cast %13 : i32 to index
      %c0_10 = arith.constant 0 : index
      %33 = vector.load %arg7[%32, %c0_10] : memref<64x1xf32, #tpu.memory_space<vmem>>, vector<1x1xf32>
      tpu.vector_store %arg7[%32, %c0_10], %31 {strides = array<i32>} : memref<64x1xf32, #tpu.memory_space<vmem>>, vector<1x1xf32>,
    }
    %c1_i32_4 = arith.constant 1 : i32
    %8 = arith.cmpi eq, %arg0, %c1_i32_4 : i32
    %9 = arith.extui %8 : i1 to i32
    %c0_i32_5 = arith.constant 0 : i32
    %10 = arith.cmpi ne, %9, %c0_i32_5 : i32
    scf.if %10 {
      %c0 = arith.constant 0 : index
      %c0_6 = arith.constant 0 : index
      %11 = vector.load %arg6[%c0, %c0_6] : memref<64x32xf32, #tpu.memory_space<vmem>>, vector<64x32xf32>
      %c0_7 = arith.constant 0 : index
      %c0_8 = arith.constant 0 : index
      %12 = vector.load %arg7[%c0_7, %c0_8] : memref<64x1xf32, #tpu.memory_space<vmem>>, vector<64x1xf32>
      %cst = arith.constant 1.000000e+00 : f32
      %13 = vector.broadcast %cst : f32 to vector<64x1xf32>
      %14 = arith.maximumf %12, %13 : vector<64x1xf32>
      %15 = vector.broadcast %14 : vector<64x1xf32> to vector<64x32xf32>
      %16 = arith.divf %11, %15 : vector<64x32xf32>
      %c0_9 = arith.constant 0 : index
      %c0_10 = arith.constant 0 : index
      %17 = vector.load %arg6[%c0_9, %c0_10] : memref<64x32xf32, #tpu.memory_space<vmem>>, vector<64x32xf32>
      tpu.vector_store %arg6[%c0_9, %c0_10], %16 {strides = array<i32>} : memref<64x32xf32, #tpu.memory_space<vmem>>, vector<64x32xf32>,
    } else {
    }
    return
  }
  func.func @transform_0(%arg0: i32, %arg1: memref<128xi32, #tpu.memory_space<smem>>, %arg2: memref<128xi32, #tpu.memory_space<smem>>, %arg3: memref<128xi32, #tpu.memory_space<smem>>) -> (i32, i32) {
    %c0_i32 = arith.constant 0 : i32
    %c0_i32_0 = arith.constant 0 : i32
    %c0_i32_1 = arith.constant 0 : i32
    return %c0_i32, %c0_i32_0 : i32, i32
  }
  func.func @transform_1(%arg0: i32, %arg1: memref<128xi32, #tpu.memory_space<smem>>, %arg2: memref<128xi32, #tpu.memory_space<smem>>, %arg3: memref<128xi32, #tpu.memory_space<smem>>) -> (i32, i32) {
    %c0_i32 = arith.constant 0 : i32
    %c0_i32_0 = arith.constant 0 : i32
    %c0_i32_1 = arith.constant 0 : i32
    return %c0_i32, %c0_i32_0 : i32, i32
  }
  func.func @transform_2(%arg0: i32, %arg1: memref<128xi32, #tpu.memory_space<smem>>, %arg2: memref<128xi32, #tpu.memory_space<smem>>, %arg3: memref<128xi32, #tpu.memory_space<smem>>) -> (i32, i32) {
    %c0_i32 = arith.constant 0 : i32
    %c0_i32_0 = arith.constant 0 : i32
    %c0_i32_1 = arith.constant 0 : i32
    return %c0_i32, %c0_i32_0 : i32, i32
  }
}

</mosaic_0001>

<bundles_post_ra>
// kernel: tpu_custom_call.1
= control target key start
LH: loop header
LB: loop body
LE: loop exit
PB: predicated region body
PF: predicated region fallthrough
CT: control target
= control target key end

     0   :  { %s561_s0 = inlined_call_operand.vmem [shape: s32[128], index: 0, kind: input, shape index: {}]   ;;  %s562_s3 = inlined_call_operand.vmem [shape: f32[64,32], index: 3, kind: input, shape index: {}]   ;;  %s563_s4 = inlined_call_operand.vmem [shape: f32[4,32], index: 4, kind: input, shape index: {}]   ;;  %s564_s5 = inlined_call_operand.vmem [shape: f32[64,32], index: 5, kind: output, shape index: {}]   ;;  %s565_s1 = inlined_call_operand.vmem [shape: s32[128], index: 1, kind: input, shape index: {}]   ;;  %s566_s2 = inlined_call_operand.vmem [shape: s32[128], index: 2, kind: input, shape index: {}]  }
   0x1   :  { %s10_s20 = sshll.u32 %s561_s0, 4  ;;  %s14_s23 = sshll.u32 %s565_s1, 4  ;;  %s11_s20 = int_to_ptr.vmem [resolvable:$true] %s10_s20  ;;  %s15_s23 = int_to_ptr.vmem [resolvable:$true] %s14_s23 }
   0x2   :  { %s346_s24 = scalar_lea.vmem %s11_s20, 16  ;;  %p351_p1 = scmp.lt.s32.totalorder %s11_s20, %s11_s20 }
   0x3   :  { %p347_p0 = scmp.ne.s32.totalorder %s11_s20, %s346_s24  ;;  %p352_p2 = scmp.lt.s32.totalorder %s346_s24, %s346_s24 }
   0x5   :  { %p353_p3 = por %p352_p2, %p351_p1 }
   0x7   :  { %p354_p4 = pnand %p353_p3, %p347_p0 }
   0x9   :  { %357 = shalt.err (!%p354_p4)  }
   0xa   :  { %s400_s25 = smov [#allocation4]   ;;  %s358_s26 = scalar_lea.vmem %s15_s23, 16 }
   0xb   :  { %13 = dma.vmem_to_smem %s11_s20, 16, %s400_s25, [#allocation3] }
   0xc   :  { %p359_p5 = scmp.ne.s32.totalorder %s15_s23, %s358_s26  ;;  %p363_p6 = scmp.lt.s32.totalorder %s15_s23, %s15_s23 }
   0xd   :  { %p364_p7 = scmp.lt.s32.totalorder %s358_s26, %s358_s26 }
   0xf   :  { %p365_p8 = por %p364_p7, %p363_p6 }
  0x11   :  { %p366_p9 = pnand %p365_p8, %p359_p5 }
  0x13   :  { %369 = shalt.err (!%p366_p9)  }
  0x14   :  { %s401_s0 = smov [#allocation5]   ;;  %s18_s28 = sshll.u32 %s566_s2, 4  ;;  %s19_s28 = int_to_ptr.vmem [resolvable:$true] %s18_s28 }
  0x15   :  { %17 = dma.vmem_to_smem %s15_s23, 16, %s401_s0, [#allocation3] }
  0x16   :  { %s370_s29 = scalar_lea.vmem %s19_s28, 16  ;;  %p375_p11 = scmp.lt.s32.totalorder %s19_s28, %s19_s28 }
  0x17   :  { %p371_p10 = scmp.ne.s32.totalorder %s19_s28, %s370_s29  ;;  %p376_p12 = scmp.lt.s32.totalorder %s370_s29, %s370_s29 }
  0x19   :  { %p377_p13 = por %p376_p12, %p375_p11 }
  0x1b   :  { %p378_p0 = pnand %p377_p13, %p371_p10 }
  0x1d   :  { %381 = shalt.err (!%p378_p0)  }
  0x1e   :  { %s402_s30 = smov [#allocation6]  }
  0x1f   :  { %21 = dma.vmem_to_smem %s19_s28, 16, %s402_s30, [#allocation3] }
  0x20   :  { %390 = dma.done.wait [#allocation3], 48 }
  0x21   :  { %391 = vsyncadd [#allocation3], 4294967248 }
  0x22   :  { %23 = sfence }
  0x23   :  { %s444_s6 = smov 0  }
  0x24 LB: > { %s450_s2 = sadd.s32 4294967295, %s394_s6   ;;  %p297_p1 = scmp.ge.s32.totalorder %s394_s6, 1  ;;  %s394_s6 = sphi %s444_s6, %s29_s6  }
  0x25   : > { %p114_p2 = scmp.lt.s32.totalorder %s394_s6, 3 }
  0x27   : > { %p115_p3 = pnand %p297_p1, %p114_p2 }
  0x28   : > { %p298_p4 = scmp.ne.s32.totalorder (!%p115_p3), %s450_s2, 0 }
  0x29   : > { %118 = sbr.rel (%p115_p3) target bundleno = 250 (0xfa), region = 28 }
  0x2e   : > { %129 = sbr.rel (%p298_p4) target bundleno = 60 (0x3c), region = 32 }
  0x33   : > { %vm130_vm0 = vcmask 261120   ;;  %vm139_vm1 = vcmask 7168   ;;  %v403_v0 = vmov 0.0  }
  0x34   : > { %131 = vst.msk [vmem:[%s564_s5] sm:$0xff] %vm130_vm0, %v403_v0  ;;  %132 = vst.msk [vmem:[%s564_s5 + $0x8] sm:$0xff] %vm130_vm0, %v403_v0 }
  0x35   : > { %133 = vst.msk [vmem:[%s564_s5 + $0x10] sm:$0xff] %vm130_vm0, %v403_v0  ;;  %134 = vst.msk [vmem:[%s564_s5 + $0x18] sm:$0xff] %vm130_vm0, %v403_v0 }
  0x36   : > { %135 = vst.msk [vmem:[%s564_s5 + $0x20] sm:$0xff] %vm130_vm0, %v403_v0  ;;  %136 = vst.msk [vmem:[%s564_s5 + $0x28] sm:$0xff] %vm130_vm0, %v403_v0 }
  0x37   : > { %137 = vst.msk [vmem:[%s564_s5 + $0x30] sm:$0xff] %vm130_vm0, %v403_v0  ;;  %138 = vst.msk [vmem:[%s564_s5 + $0x38] sm:$0xff] %vm130_vm0, %v403_v0 }
  0x38   : > { %140 = vst.msk [vmem:[#allocation2] sm:$0xff] %vm139_vm1, %v403_v0  ;;  %141 = vst.msk [vmem:[#allocation2 + $0x8] sm:$0xff] %vm139_vm1, %v403_v0 }
  0x39   : > { %142 = vst.msk [vmem:[#allocation2 + $0x10] sm:$0xff] %vm139_vm1, %v403_v0  ;;  %143 = vst.msk [vmem:[#allocation2 + $0x18] sm:$0xff] %vm139_vm1, %v403_v0 }
  0x3a   : > { %144 = vst.msk [vmem:[#allocation2 + $0x20] sm:$0xff] %vm139_vm1, %v403_v0  ;;  %145 = vst.msk [vmem:[#allocation2 + $0x28] sm:$0xff] %vm139_vm1, %v403_v0 }
  0x3b   : > { %146 = vst.msk [vmem:[#allocation2 + $0x30] sm:$0xff] %vm139_vm1, %v403_v0  ;;  %147 = vst.msk [vmem:[#allocation2 + $0x38] sm:$0xff] %vm139_vm1, %v403_v0 }
  0x3c PF: > { %s299_s23 = sshll.u32 %s450_s2, 6 }
  0x3d   : > { %s149_s24 = ssub.s32 128, %s299_s23 }
  0x3e   : > { %p150_p5 = scmp.lt.s32.totalorder %s149_s24, 64  ;;  %p304_p6 = scmp.le.s32.totalorder %s149_s24, 0 }
  0x3f   : > { %s396_s26 = smov (!%p304_p6), 0  }
  0x40   : > { %s151_s25 = scalar_select %p150_p5, %s149_s24, 64 }
  0x41   : > { %287 = sbr.rel (%p304_p6) target bundleno = 86 (0x56), region = 64 }
  0x46 LB: >> { %s158_s0 = sadd.s32 %s398_s26, %s299_s23  ;;  %vm175_vm2 = vcmask 0   ;;  %vm170_vm3 = vcmask 253952   ;;  %s155_s26 = sadd.s32 1, %s398_s26   ;;  %s398_s26 = sphi %s396_s26, %s155_s26  }
  0x47   : >> { %s159_s1 = sld [smem:[#allocation4 + %s158_s0]]  ;;  %p154_p7 = scmp.ge.s32.totalorder %s155_s26, %s151_s25 }
  0x48   : >> { %s160_s27 = sld [smem:[#allocation5 + %s158_s0]] }
  0x49   : >> { %s161_s28 = sld [smem:[#allocation6 + %s158_s0]] }
  0x4d   : >> { %s167_s7 = scalar_lea.vmem %s564_s5, %s159_s1  ;;  %s172_s11 = scalar_lea.vmem [#allocation2], %s159_s1 }
  0x4e   : >> { %s162_s10 = scalar_lea.vmem %s562_s3, %s160_s27  ;;  %v173_v1 = vld [vmem:[%s172_s11] sm:$0x1] }
  0x4f   : >> { %v163_v2 = vld [vmem:[%s162_s10] sm:$0x1]  ;;  %s164_s14 = scalar_lea.vmem %s563_s4, %s161_s28  ;;  %v174_v3 = vadd.f32 1.0, %v173_v1 }
  0x50   : >> { %v165_v4 = vld [vmem:[%s164_s14] sm:$0x1] }
  0x51   : >> { %v168_v5 = vld [vmem:[%s167_s7] sm:$0x1]  ;;  %v166_v6 = vmul.f32 %v165_v4, %v163_v2  ;;  %176 = vst.msk [vmem:[%s172_s11] sm:$0x1] %vm175_vm2, %v174_v3  ;;  %157 = sbr.rel (!%p154_p7) target bundleno = 70 (0x46), region = 70 }
  0x53   : >> { %v169_v7 = vadd.f32 %v168_v5, %v166_v6 }
  0x55   : >> { %171 = vst.msk [vmem:[%s167_s7] sm:$0x1] %vm170_vm3, %v169_v7 }
  0x56 PF: > { %p301_p8 = scmp.ne.s32.totalorder %s450_s2, 1 }
  0x58   : > { %180 = sbr.rel (%p301_p8) target bundleno = 250 (0xfa), region = 43 }
  0x5d   : > { %v191_v8 = vld [vmem:[#allocation2 + $0x10] sm:$0xff]  ;;  %v189_v9 = vld [vmem:[#allocation2] sm:$0xff]  ;;  %v192_v10 = vld [vmem:[#allocation2 + $0x18] sm:$0xff]  ;;  %v404_v11 = vmov 0   ;;  %vm261_vm4 = vcmask 261120  }
  0x5e   : > { %329 = vset.pattern.permute.xlu1 %v404_v11  ;;  %328 = vset.pattern.permute.xlu0 %v404_v11  ;;  %v199_v12 = vmax.f32 %v191_v8, 1.0  ;;  %v197_v13 = vmax.f32 %v189_v9, 1.0  ;;  %v190_v14 = vld [vmem:[#allocation2 + $0x8] sm:$0xff]  ;;  %v200_v15 = vmax.f32 %v192_v10, 1.0  ;;  %v193_v18 = vld [vmem:[#allocation2 + $0x20] sm:$0xff]  ;;  %v196_v21 = vld [vmem:[#allocation2 + $0x38] sm:$0xff] }
  0x5f   : > { %v198_v16 = vmax.f32 %v190_v14, 1.0  ;;  %v194_v17 = vld [vmem:[#allocation2 + $0x28] sm:$0xff]  ;;  %v201_v20 = vmax.f32 %v193_v18, 1.0  ;;  %v195_v22 = vld [vmem:[#allocation2 + $0x30] sm:$0xff]  ;;  %v204_v23 = vmax.f32 %v196_v21, 1.0  ;;  %v181_v34 = vld [vmem:[%s564_s5] sm:$0xff] }
  0x60   : > { %217 = vperm.xlu1 %329, %v199_v12   ;;  %207 = vperm.xlu0 %328, %v197_v13   ;;  %v202_v19 = vmax.f32 %v194_v17, 1.0  ;;  %v203_v24 = vmax.f32 %v195_v22, 1.0  ;;  %v183_v31 = vld [vmem:[%s564_s5 + $0x10] sm:$0xff]  ;;  %v184_v39 = vld [vmem:[%s564_s5 + $0x18] sm:$0xff]  ;;  %v182_v40 = vld [vmem:[%s564_s5 + $0x8] sm:$0xff] }
  0x61   : > { %v186_v45 = vld [vmem:[%s564_s5 + $0x28] sm:$0xff]  ;;  %v185_v46 = vld [vmem:[%s564_s5 + $0x20] sm:$0xff]  ;;  %v188_v51 = vld [vmem:[%s564_s5 + $0x38] sm:$0xff] }
  0x62   : > { %v187_v52 = vld [vmem:[%s564_s5 + $0x30] sm:$0xff] }
  0x64   : > { %222 = vperm.xlu1 %329, %v200_v15   ;;  %212 = vperm.xlu0 %328, %v198_v16  }
  0x68   : > { %232 = vperm.xlu1 %329, %v202_v19   ;;  %227 = vperm.xlu0 %328, %v201_v20  }
  0x6c   : > { %242 = vperm.xlu1 %329, %v204_v23   ;;  %237 = vperm.xlu0 %328, %v203_v24  }
  0xdb   : > { %v218_v25 = vpop.permute.xlu1 %217  ;;  %v208_v26 = vpop.permute.xlu0 %207 }
  0xdc   : > { %330 = vrcp.f32 %v218_v25 }
  0xdd   : > { %332 = vrcp.f32 %v208_v26 }
  0xdf   : > { %v223_v27 = vpop.permute.xlu1 %222  ;;  %v213_v28 = vpop.permute.xlu0 %212 }
  0xe0   : > { %334 = vrcp.f32 %v223_v27 }
  0xe1   : > { %336 = vrcp.f32 %v213_v28 }
  0xe3   : > { %v233_v29 = vpop.permute.xlu1 %232  ;;  %v228_v30 = vpop.permute.xlu0 %227 }
  0xe4   : > { %338 = vrcp.f32 %v233_v29 }
  0xe5   : > { %340 = vrcp.f32 %v228_v30 }
  0xe7   : > { %v243_v32 = vpop.permute.xlu1 %242  ;;  %v238_v33 = vpop.permute.xlu0 %237 }
  0xe8   : > { %342 = vrcp.f32 %v243_v32 }
  0xe9   : > { %v331_v35 = vpop.eup %330  ;;  %344 = vrcp.f32 %v238_v33 }
  0xea   : > { %v333_v36 = vpop.eup %332  ;;  %v250_v37 = vmul.f32 %v331_v35, %v183_v31 }
  0xeb   : > { %v246_v38 = vmul.f32 %v333_v36, %v181_v34 }
  0xec   : > { %264 = vst.msk [vmem:[%s564_s5 + $0x10] sm:$0xff] %vm261_vm4, %v250_v37 }
  0xed   : > { %v335_v41 = vpop.eup %334  ;;  %262 = vst.msk [vmem:[%s564_s5] sm:$0xff] %vm261_vm4, %v246_v38 }
  0xee   : > { %v337_v42 = vpop.eup %336  ;;  %v252_v43 = vmul.f32 %v335_v41, %v184_v39 }
  0xef   : > { %v248_v44 = vmul.f32 %v337_v42, %v182_v40 }
  0xf0   : > { %265 = vst.msk [vmem:[%s564_s5 + $0x18] sm:$0xff] %vm261_vm4, %v252_v43 }
  0xf1   : > { %v339_v47 = vpop.eup %338  ;;  %263 = vst.msk [vmem:[%s564_s5 + $0x8] sm:$0xff] %vm261_vm4, %v248_v44 }
  0xf2   : > { %v341_v48 = vpop.eup %340  ;;  %v256_v49 = vmul.f32 %v339_v47, %v186_v45 }
  0xf3   : > { %v254_v50 = vmul.f32 %v341_v48, %v185_v46 }
  0xf4   : > { %267 = vst.msk [vmem:[%s564_s5 + $0x28] sm:$0xff] %vm261_vm4, %v256_v49 }
  0xf5   : > { %v343_v53 = vpop.eup %342  ;;  %266 = vst.msk [vmem:[%s564_s5 + $0x20] sm:$0xff] %vm261_vm4, %v254_v50 }
  0xf6   : > { %v345_v54 = vpop.eup %344  ;;  %v260_v55 = vmul.f32 %v343_v53, %v188_v51 }
  0xf7   : > { %v258_v56 = vmul.f32 %v345_v54, %v187_v52 }
  0xf8   : > { %269 = vst.msk [vmem:[%s564_s5 + $0x38] sm:$0xff] %vm261_vm4, %v260_v55 }
  0xf9   : > { %268 = vst.msk [vmem:[%s564_s5 + $0x30] sm:$0xff] %vm261_vm4, %v258_v56 }
  0xfa PF: > { %s29_s6 = sadd.s32 1, %s394_s6  }
  0xfb   : > { %p26_p9 = scmp.ge.s32.totalorder %s29_s6, 4  }
  0xfd   :  { %28 = sbr.rel (!%p26_p9) target bundleno = 36 (0x24), region = 81 }

</bundles_post_ra>
